<compile_context>
chip_gen: v5e
topology: v5e:2x2
jax: 0.10.0
libtpu: 0.0.40
codegen_flags: <defaults>
</compile_context>

<pallas_src>
import functools

import jax
import jax.numpy as jnp
from jax.experimental import pallas as pl
from jax.experimental.pallas import tpu as pltpu


def _round_up(x, m):
    return pl.cdiv(x, m) * m


def _gmp_single_kernel(x_ref, o_ref):
    # Whole length in one block: plain per-row max (VALU folds + one XLU
    # cross-lane reduce), exact in any float dtype.
    o_ref[...] = jnp.max(x_ref[...], axis=-1, keepdims=True).astype(o_ref.dtype)


def _gmp_reduce_kernel(x_ref, o_ref, acc_ref, *, length, tile_l):
    # x_ref: (TM, TL) input tile, o_ref: (TM, 1) output tile (resident over
    # the L grid axis), acc_ref: (TM, 1) f32 running-max scratch.
    k = pl.program_id(1)

    @pl.when(k == 0)
    def _init():
        acc_ref[...] = jnp.full(acc_ref.shape, -jnp.inf, dtype=acc_ref.dtype)

    x = x_ref[...]
    if length % tile_l != 0:
        # The last L tile reads out-of-bounds lanes (undefined data): mask
        # every lane >= the true length with -inf before reducing.  For
        # non-last tiles rem == TL so the select is a no-op (hidden under DMA).
        rem = jnp.minimum(length - k * tile_l, tile_l)
        col = jax.lax.broadcasted_iota(jnp.int32, x.shape, dimension=1)
        x = jnp.where(col < rem, x, jnp.asarray(-jnp.inf, dtype=x.dtype))

    tile_max = jnp.max(x, axis=-1, keepdims=True).astype(acc_ref.dtype)
    acc_ref[...] = jnp.maximum(acc_ref[...], tile_max)

    @pl.when(k == pl.num_programs(1) - 1)
    def _finalize():
        o_ref[...] = acc_ref[...].astype(o_ref.dtype)


@functools.partial(jax.jit, static_argnames=("target_block_bytes",))
def global_max_pool1d(x, *, target_block_bytes=4 * 1024 * 1024):
    """x: (N, C, L) floating-point -> (N, C, 1), max over the last axis."""
    assert jnp.issubdtype(x.dtype, jnp.floating), "floating-point input required"
    N, C, L = x.shape
    rows = N * C
    x2 = x.reshape(rows, L)

    itemsize = jnp.dtype(x.dtype).itemsize
    sublane = {4: 8, 2: 16, 1: 32}.get(itemsize, 8)

    L_aligned = int(_round_up(L, 128))
    rows_aligned = int(_round_up(rows, sublane))

    # Lane tile: as wide as the byte budget allows at the minimum row tile,
    # capped at the (128-aligned) full length.
    tl_budget = max(128, (target_block_bytes // (sublane * itemsize)) // 128 * 128)
    one_shot = L_aligned <= tl_budget  # whole L fits in one block
    TL = L if one_shot else int(tl_budget)
    tl_for_budget = L_aligned if one_shot else TL

    # Row tile: fill the remaining byte budget; sublane multiple, bounded by
    # the row count, and small enough that the "parallel" rows axis has >= 2
    # tiles (feeds both v7x TensorCores) whenever rows permit.
    tm = (target_block_bytes // (tl_for_budget * itemsize)) // sublane * sublane
    TM = int(max(sublane, min(tm, rows_aligned)))
    if rows_aligned >= 2 * sublane:
        TM = int(min(TM, _round_up(pl.cdiv(rows, 2), sublane)))
    if TM >= rows:
        TM = rows  # single full-dim row tile: no row OOB, no output slicing

    grid_rows = int(pl.cdiv(rows, TM))
    rows_out = grid_rows * TM  # >= rows; garbage tail rows sliced off below

    cost = pl.CostEstimate(
        flops=rows * L,
        transcendentals=0,
        bytes_accessed=rows * L * itemsize + rows * itemsize,
    )
    cparams_kwargs = dict(vmem_limit_bytes=48 * 1024 * 1024)

    if one_shot:
        out = pl.pallas_call(
            _gmp_single_kernel,
            out_shape=jax.ShapeDtypeStruct((rows_out, 1), x.dtype),
            grid_spec=pltpu.PrefetchScalarGridSpec(
                num_scalar_prefetch=0,
                grid=(grid_rows,),
                in_specs=[pl.BlockSpec((TM, L), lambda i: (i, 0))],
                out_specs=pl.BlockSpec((TM, 1), lambda i: (i, 0)),
            ),
            compiler_params=pltpu.CompilerParams(
                dimension_semantics=("parallel",), **cparams_kwargs
            ),
            cost_estimate=cost,
        )(x2)
    else:
        grid_l = int(pl.cdiv(L, TL))
        kernel = functools.partial(_gmp_reduce_kernel, length=L, tile_l=TL)
        out = pl.pallas_call(
            kernel,
            out_shape=jax.ShapeDtypeStruct((rows_out, 1), x.dtype),
            grid_spec=pltpu.PrefetchScalarGridSpec(
                num_scalar_prefetch=0,
                grid=(grid_rows, grid_l),
                in_specs=[pl.BlockSpec((TM, TL), lambda i, k: (i, k))],
                out_specs=pl.BlockSpec((TM, 1), lambda i, k: (i, 0)),
                scratch_shapes=[pltpu.VMEM((TM, 1), jnp.float32)],
            ),
            compiler_params=pltpu.CompilerParams(
                dimension_semantics=("parallel", "arbitrary"), **cparams_kwargs
            ),
            cost_estimate=cost,
        )(x2)

    return out[:rows, :].reshape(N, C, 1)


if __name__ == "__main__":
    key = jax.random.PRNGKey(0)
    k1, k2, k3 = jax.random.split(key, 3)

    # Case 1: small shape consistent with the module's (batch, channels, length).
    x1 = jax.random.normal(k1, (2, 4, 16), dtype=jnp.float32)
    out1 = jax.block_until_ready(global_max_pool1d(x1))
    ref1 = jnp.max(x1, axis=-1, keepdims=True)  # == F.max_pool1d(x, kernel_size=L)
    assert out1.shape == (2, 4, 1), out1.shape
    assert jnp.allclose(out1, ref1), "mismatch vs reference (small case)"

    # Case 2: rows not a sublane multiple, L not a lane multiple (partial row
    # tile + non-128-aligned full-L block), all-negative input.
    x2 = -jnp.abs(jax.random.normal(k2, (3, 5, 200), dtype=jnp.float32))
    out2 = jax.block_until_ready(global_max_pool1d(x2))
    ref2 = jnp.max(x2, axis=-1, keepdims=True)
    assert out2.shape == (3, 5, 1), out2.shape
    assert jnp.allclose(out2, ref2), "mismatch vs reference (partial-tile case)"

    # Case 3: force the multi-step L-reduction path (tiny block budget) with an
    # unaligned L tail and all-negative input -> exercises -inf init + in-kernel
    # tail masking + accumulator finalize.
    x3 = -jnp.abs(jax.random.normal(k3, (2, 4, 300), dtype=jnp.float32))
    out3 = jax.block_until_ready(global_max_pool1d(x3, target_block_bytes=4096))
    ref3 = jnp.max(x3, axis=-1, keepdims=True)
    assert out3.shape == (2, 4, 1), out3.shape
    assert jnp.allclose(out3, ref3), "mismatch vs reference (reduction case)"

    print("KERNEL_OK")
</pallas_src>

<mosaic_0001>
module attributes {stable_mosaic.version = 11 : i64} {
  func.func @_gmp_single_kernel(%arg0: i32, %arg1: memref<8x16xf32, #tpu.memory_space<vmem>>, %arg2: memref<8x1xf32, #tpu.memory_space<vmem>>) attributes {dimension_semantics = [#tpu.dimension_semantics<parallel>], iteration_bounds = array<i64: 1>, scalar_prefetch = 0 : i64, scratch_operands = 0 : i64, tpu.core_type = #tpu.core_type<tc>, window_params = [{transform_indices = @transform_0, window_bounds = array<i64: 8, 16>}, {transform_indices = @transform_1, window_bounds = array<i64: 8, 1>}]} {
    %c0 = arith.constant 0 : index
    %c0_0 = arith.constant 0 : index
    %0 = vector.load %arg1[%c0, %c0_0] : memref<8x16xf32, #tpu.memory_space<vmem>>, vector<8x16xf32>
    %cst = arith.constant dense<0xFF800000> : vector<8xf32>
    %1 = vector.multi_reduction <maximumf>, %0, %cst [1] : vector<8x16xf32> to vector<8xf32>
    %2 = vector.shape_cast %1 : vector<8xf32> to vector<8x1xf32>
    %c0_1 = arith.constant 0 : index
    %c0_2 = arith.constant 0 : index
    %3 = vector.load %arg2[%c0_1, %c0_2] : memref<8x1xf32, #tpu.memory_space<vmem>>, vector<8x1xf32>
    tpu.vector_store %arg2[%c0_1, %c0_2], %2 {strides = array<i32>} : memref<8x1xf32, #tpu.memory_space<vmem>>, vector<8x1xf32>,
    return
  }
  func.func @transform_0(%arg0: i32) -> (i32, i32) {
    %c0_i32 = arith.constant 0 : i32
    %c0_i32_0 = arith.constant 0 : i32
    return %arg0, %c0_i32 : i32, i32
  }
  func.func @transform_1(%arg0: i32) -> (i32, i32) {
    %c0_i32 = arith.constant 0 : i32
    %c0_i32_0 = arith.constant 0 : i32
    return %arg0, %c0_i32 : i32, i32
  }
}

</mosaic_0001>

<bundles_post_ra>
// kernel: global_max_pool1d.1
= control target key start
LH: loop header
LB: loop body
LE: loop exit
PB: predicated region body
PF: predicated region fallthrough
CT: control target
= control target key end

     0   :  { %6 = vsyncpa [#allocation3], 0  ;;  %s61_s9 = smov [#allocation2]   ;;  %s78_s0 = inlined_call_operand.hbm [shape: f32[8,16], index: 0, kind: input, shape index: {}]   ;;  %s79_s1 = inlined_call_operand.vmem [shape: f32[8,1], index: 1, kind: output, shape index: {}]  }
   0x1   :  { %s12_s8 = sshll.u32 %s78_s0, 4  ;;  %s14_s10 = sshll.u32 %s61_s9, 4  ;;  %s13_s8 = int_to_ptr.hbm [resolvable:$true] %s12_s8  ;;  %s15_s10 = int_to_ptr.vmem [resolvable:$true] %s14_s10 }
   0x2   :  { %17 = dma.hbm_to_vmem [thread:$0]  %s13_s8, 128, %s15_s10, [#allocation3]  }
   0x3   :  { %59 = dma.done.wait [#allocation3], 128  }
   0x4   :  { %60 = vsyncadd [#allocation3], 4294967168  ;;  %vm23_vm0 = vcmask 130048   ;;  %v22_v0 = vld [vmem:[#allocation2] sm:$0xff]  ;;  %vm27_vm1 = vcmask 7168  }
   0x5   :  { %v24_v1 = vsel %vm23_vm0, %v22_v0, -inf }
   0x6   :  { %25 = vmax.xlane.f32.xlu0 %v24_v1 }
  0x79   :  { %v26_v2 = vpop.xlane.xlu0 %25 }
  0x7a   :  { %28 = vst.msk [vmem:[%s79_s1] sm:$0xff] %vm27_vm1, %v26_v2 }
  0x7b   :  { %33 = vsyncpa [#allocation3], 1 }

</bundles_post_ra>
